<compile_context>
chip_gen: v7x
topology: tpu7x:2x2x1
jax: 0.10.0
libtpu: 0.0.40
codegen_flags: <defaults>
</compile_context>

<pallas_src>
import jax
import jax.numpy as jnp
import numpy as np
from jax import lax
from jax.experimental import pallas as pl
from jax.experimental.pallas import tpu as pltpu


def bigblock(x_nchw, w1, s1, b1, w2row, s2, b2, w3, s3, b3):
    """x_nchw: (N, Cin, H, W) f32.  Weights pre-arranged:
       w1:    (Cmid, Cin)      bf16   (conv1 1x1, OI)
       w2row: (Cmid, 9*Cmid)   bf16   (conv2 3x3, columns ordered tap-major, cin-minor)
       w3:    (Cout, Cmid)     bf16   (conv3 1x1, OI)
       s*/b*: (C, 1)           f32    (folded BN scale / bias, channels on sublanes)
    """
    N, Cin, H, W = x_nchw.shape
    Cmid = w1.shape[0]
    Cout = w3.shape[0]
    HW = H * W
    assert Cin == Cout, "identity shortcut requires inplanes == outplanes"

    x = x_nchw.reshape(N, Cin, HW)  # free reshape: NCHW is already contiguous this way

    def kernel(x_ref, w1_ref, s1_ref, b1_ref, w2_ref, s2_ref, b2_ref,
               w3_ref, s3_ref, b3_ref, o_ref):
        # x block: (1, Cin, HW) f32, lane-dense (HW = 256 lanes).
        x_f32 = x_ref[0]                               # (Cin, HW) f32, kept for residual
        x_bf = x_f32.astype(jnp.bfloat16)              # bf16 view for the MXU

        # ---- conv1 (1x1) + bn1 + relu : (Cmid,Cin)x(Cin,HW), N = HW = 256 ----
        y = jnp.dot(w1_ref[...], x_bf, preferred_element_type=jnp.float32)
        y = jnp.maximum(y * s1_ref[...] + b1_ref[...], 0.0)       # (Cmid, HW) f32

        # ---- conv2 (3x3, pad=1, stride=1) as ONE im2col matmul, K = 9*Cmid ----
        y_bf = y.astype(jnp.bfloat16)
        guard = jnp.zeros((Cmid, 8), jnp.bfloat16)   # keeps every tap slice in range
        halo = jnp.zeros((Cmid, W), jnp.bfloat16)    # zero image row above / below (H pad)
        ypf = jnp.concatenate([guard, halo, y_bf, halo, guard], axis=1)
        # ypf lanes: [8 guard | W top-halo | HW pixels | W bottom-halo | 8 guard]

        # pixel-column index along the lane axis, for masking the W-direction halo
        lane = lax.broadcasted_iota(jnp.int32, (1, HW), 1)
        if W & (W - 1) == 0:
            wcol = jnp.bitwise_and(lane, W - 1)
        else:
            wcol = lane % W

        slabs = []
        for kh in range(3):
            for kw in range(3):
                # output pixel p reads padded flat index p + kh*W + kw - 1
                start = 7 + kh * W + kw                 # static, >= 0
                slab = ypf[:, start:start + HW]         # (Cmid, HW) lane-shifted tap
                if kw == 0:                             # left neighbour: invalid at w == 0
                    slab = jnp.where(wcol >= 1, slab, jnp.zeros_like(slab))
                elif kw == 2:                           # right neighbour: invalid at w == W-1
                    slab = jnp.where(wcol <= W - 2, slab, jnp.zeros_like(slab))
                slabs.append(slab)
        patches = jnp.concatenate(slabs, axis=0)        # (9*Cmid, HW) bf16, sublane-aligned

        y = jnp.dot(w2_ref[...], patches, preferred_element_type=jnp.float32)
        y = jnp.maximum(y * s2_ref[...] + b2_ref[...], 0.0)       # (Cmid, HW)

        # ---- conv3 (1x1) + bn3 ----
        y = jnp.dot(w3_ref[...], y.astype(jnp.bfloat16),
                    preferred_element_type=jnp.float32)           # (Cout, HW)
        y = y * s3_ref[...] + b3_ref[...]

        # ---- identity shortcut (f32) + final relu; dense 256-lane store ----
        o_ref[0] = jnp.maximum(y + x_f32, 0.0).astype(o_ref.dtype)

    out = pl.pallas_call(
        kernel,
        out_shape=jax.ShapeDtypeStruct((N, Cout, HW), x.dtype),
        grid_spec=pltpu.PrefetchScalarGridSpec(
            num_scalar_prefetch=0,
            grid=(N,),   # one image per step; 2 parallel steps -> both TCs busy on v7x
            in_specs=[
                pl.BlockSpec((1, Cin, HW), lambda n: (n, 0, 0)),
                pl.BlockSpec((Cmid, Cin), lambda n: (0, 0)),
                pl.BlockSpec((Cmid, 1), lambda n: (0, 0)),
                pl.BlockSpec((Cmid, 1), lambda n: (0, 0)),
                pl.BlockSpec((Cmid, 9 * Cmid), lambda n: (0, 0)),
                pl.BlockSpec((Cmid, 1), lambda n: (0, 0)),
                pl.BlockSpec((Cmid, 1), lambda n: (0, 0)),
                pl.BlockSpec((Cout, Cmid), lambda n: (0, 0)),
                pl.BlockSpec((Cout, 1), lambda n: (0, 0)),
                pl.BlockSpec((Cout, 1), lambda n: (0, 0)),
            ],
            out_specs=pl.BlockSpec((1, Cout, HW), lambda n: (n, 0, 0)),
        ),
        compiler_params=pltpu.CompilerParams(
            dimension_semantics=("parallel",)),
        # NOTE: at real ResNet channel counts, also set vmem_limit_bytes and keep
        # weights bf16 to stay inside v7x's smaller (64 MiB) VMEM.
    )(x, w1, s1, b1, w2row, s2, b2, w3, s3, b3)

    return out.reshape(N, Cout, H, W)


# ----------------------------- host-side glue -----------------------------

def fold_bn(gamma, beta, mean, var, eps=1e-5):
    scale = gamma / jnp.sqrt(var + eps)
    bias = beta - mean * scale
    return scale.reshape(-1, 1), bias.reshape(-1, 1)   # (C, 1): channels on sublanes


def make_params(key, cin, cmid, cout):
    ks = jax.random.split(key, 6)
    # conv weights in PyTorch OIHW layout
    w1_oihw = jax.random.normal(ks[0], (cmid, cin, 1, 1), jnp.float32) * 0.1
    w2_oihw = jax.random.normal(ks[1], (cmid, cmid, 3, 3), jnp.float32) * 0.1
    w3_oihw = jax.random.normal(ks[2], (cout, cmid, 1, 1), jnp.float32) * 0.1

    def bn(k, c):
        kg, kb, km, kv = jax.random.split(k, 4)
        gamma = jax.random.uniform(kg, (c,), jnp.float32, 0.5, 1.5)
        beta = jax.random.normal(kb, (c,), jnp.float32) * 0.1
        mean = jax.random.normal(km, (c,), jnp.float32) * 0.1
        var = jax.random.uniform(kv, (c,), jnp.float32, 0.5, 1.5)
        return gamma, beta, mean, var

    bn1 = bn(ks[3], cmid)
    bn2 = bn(ks[4], cmid)
    bn3 = bn(ks[5], cout)
    return (w1_oihw, bn1), (w2_oihw, bn2), (w3_oihw, bn3)


def ref_bigblock(x, w1_oihw, bn1, w2_oihw, bn2, w3_oihw, bn3, eps=1e-5):
    """Pure-JAX NCHW f32 reference mirroring the PyTorch forward (eval mode)."""
    dn = ('NCHW', 'OIHW', 'NCHW')

    def bn_apply(y, p):
        g, b, m, v = p
        s = g / jnp.sqrt(v + eps)
        return y * s[None, :, None, None] + (b - m * s)[None, :, None, None]

    y = lax.conv_general_dilated(x, w1_oihw, (1, 1), 'VALID', dimension_numbers=dn)
    y = jnp.maximum(bn_apply(y, bn1), 0.0)
    y = lax.conv_general_dilated(y, w2_oihw, (1, 1), ((1, 1), (1, 1)),
                                 dimension_numbers=dn)
    y = jnp.maximum(bn_apply(y, bn2), 0.0)
    y = lax.conv_general_dilated(y, w3_oihw, (1, 1), 'VALID', dimension_numbers=dn)
    y = bn_apply(y, bn3)
    return jnp.maximum(y + x, 0.0)


if __name__ == "__main__":
    key = jax.random.PRNGKey(0)
    kx, kp = jax.random.split(key)

    # BigBlock(inplanes=32, midplanes=16, outplanes=32,
    #          downsample=False, downsample_shortcut=False)
    N, H, W = 2, 16, 16
    CIN, CMID, COUT = 32, 16, 32

    x = jax.random.normal(kx, (N, CIN, H, W), jnp.float32)     # NCHW input
    (w1_oihw, bn1), (w2_oihw, bn2), (w3_oihw, bn3) = make_params(kp, CIN, CMID, COUT)

    s1, b1 = fold_bn(*bn1)
    s2, b2 = fold_bn(*bn2)
    s3, b3 = fold_bn(*bn3)
    # Kernel-form weights (bf16 for the MXU):
    w1 = w1_oihw.reshape(CMID, CIN).astype(jnp.bfloat16)
    # im2col weight: column index = (kh*3 + kw)*Cmid + cin  (tap-major, cin-minor)
    w2row = jnp.transpose(w2_oihw, (0, 2, 3, 1)).reshape(CMID, 9 * CMID).astype(jnp.bfloat16)
    w3 = w3_oihw.reshape(COUT, CMID).astype(jnp.bfloat16)

    out = bigblock(x, w1, s1, b1, w2row, s2, b2, w3, s3, b3)
    out = jax.block_until_ready(out)

    ref = ref_bigblock(x, w1_oihw, bn1, w2_oihw, bn2, w3_oihw, bn3)
    # bf16 matmul operands vs f32 reference -> loosen tolerance accordingly.
    np.testing.assert_allclose(np.asarray(out), np.asarray(ref),
                               rtol=2e-2, atol=2e-2)
    print("KERNEL_OK")
</pallas_src>

<mosaic_0001>
module attributes {stable_mosaic.version = 11 : i64} {
  func.func @kernel(%arg0: i32, %arg1: memref<1x32x256xf32, #tpu.memory_space<vmem>>, %arg2: memref<16x32xbf16, #tpu.memory_space<vmem>>, %arg3: memref<16x1xf32, #tpu.memory_space<vmem>>, %arg4: memref<16x1xf32, #tpu.memory_space<vmem>>, %arg5: memref<16x144xbf16, #tpu.memory_space<vmem>>, %arg6: memref<16x1xf32, #tpu.memory_space<vmem>>, %arg7: memref<16x1xf32, #tpu.memory_space<vmem>>, %arg8: memref<32x16xbf16, #tpu.memory_space<vmem>>, %arg9: memref<32x1xf32, #tpu.memory_space<vmem>>, %arg10: memref<32x1xf32, #tpu.memory_space<vmem>>, %arg11: memref<1x32x256xf32, #tpu.memory_space<vmem>>) attributes {dimension_semantics = [#tpu.dimension_semantics<parallel>], iteration_bounds = array<i64: 2>, scalar_prefetch = 0 : i64, scratch_operands = 0 : i64, tpu.core_type = #tpu.core_type<tc>, window_params = [{transform_indices = @transform_0, window_bounds = array<i64: 1, 32, 256>}, {pipeline_mode = #tpu.pipeline_mode<synchronous>, transform_indices = @transform_1, window_bounds = array<i64: 16, 32>}, {pipeline_mode = #tpu.pipeline_mode<synchronous>, transform_indices = @transform_2, window_bounds = array<i64: 16, 1>}, {pipeline_mode = #tpu.pipeline_mode<synchronous>, transform_indices = @transform_3, window_bounds = array<i64: 16, 1>}, {pipeline_mode = #tpu.pipeline_mode<synchronous>, transform_indices = @transform_4, window_bounds = array<i64: 16, 144>}, {pipeline_mode = #tpu.pipeline_mode<synchronous>, transform_indices = @transform_5, window_bounds = array<i64: 16, 1>}, {pipeline_mode = #tpu.pipeline_mode<synchronous>, transform_indices = @transform_6, window_bounds = array<i64: 16, 1>}, {pipeline_mode = #tpu.pipeline_mode<synchronous>, transform_indices = @transform_7, window_bounds = array<i64: 32, 16>}, {pipeline_mode = #tpu.pipeline_mode<synchronous>, transform_indices = @transform_8, window_bounds = array<i64: 32, 1>}, {pipeline_mode = #tpu.pipeline_mode<synchronous>, transform_indices = @transform_9, window_bounds = array<i64: 32, 1>}, {transform_indices = @transform_10, window_bounds = array<i64: 1, 32, 256>}]} {
    %c0 = arith.constant 0 : index
    %c0_0 = arith.constant 0 : index
    %c0_1 = arith.constant 0 : index
    %0 = vector.load %arg1[%c0, %c0_0, %c0_1] : memref<1x32x256xf32, #tpu.memory_space<vmem>>, vector<1x32x256xf32>
    %1 = vector.shape_cast %0 : vector<1x32x256xf32> to vector<32x256xf32>
    %2 = arith.truncf %1 : vector<32x256xf32> to vector<32x256xbf16>
    %c0_2 = arith.constant 0 : index
    %c0_3 = arith.constant 0 : index
    %3 = vector.load %arg2[%c0_2, %c0_3] : memref<16x32xbf16, #tpu.memory_space<vmem>>, vector<16x32xbf16>
    %cst = arith.constant dense<0.000000e+00> : vector<16x256xf32>
    %4 = tpu.matmul %3, %2, %cst {dimension_numbers = #tpu.dot_dimension_numbers<[1], [0], [0], [1], [0, 0, 1, 1], [], []>} : vector<16x32xbf16>, vector<32x256xbf16>, vector<16x256xf32> -> vector<16x256xf32>
    %c0_4 = arith.constant 0 : index
    %c0_5 = arith.constant 0 : index
    %5 = vector.load %arg3[%c0_4, %c0_5] : memref<16x1xf32, #tpu.memory_space<vmem>>, vector<16x1xf32>
    %6 = vector.broadcast %5 : vector<16x1xf32> to vector<16x256xf32>
    %7 = arith.mulf %4, %6 : vector<16x256xf32>
    %c0_6 = arith.constant 0 : index
    %c0_7 = arith.constant 0 : index
    %8 = vector.load %arg4[%c0_6, %c0_7] : memref<16x1xf32, #tpu.memory_space<vmem>>, vector<16x1xf32>
    %9 = vector.broadcast %8 : vector<16x1xf32> to vector<16x256xf32>
    %10 = arith.addf %7, %9 : vector<16x256xf32>
    %cst_8 = arith.constant 0.000000e+00 : f32
    %11 = vector.broadcast %cst_8 : f32 to vector<16x256xf32>
    %12 = arith.maximumf %10, %11 : vector<16x256xf32>
    %13 = arith.truncf %12 : vector<16x256xf32> to vector<16x256xbf16>
    %cst_9 = arith.constant 0.000000e+00 : bf16
    %14 = vector.broadcast %cst_9 : bf16 to vector<16x8xbf16>
    %cst_10 = arith.constant 0.000000e+00 : bf16
    %15 = vector.broadcast %cst_10 : bf16 to vector<16x16xbf16>
    %16 = tpu.concatenate %14, %15, %13, %15, %14 in 1 : vector<16x8xbf16>, vector<16x16xbf16>, vector<16x256xbf16>, vector<16x16xbf16>, vector<16x8xbf16> -> vector<16x304xbf16>
    %17 = tpu.iota {dimensions = array<i32: 1>} : vector<1x256xi32>
    %c15_i32 = arith.constant 15 : i32
    %18 = vector.broadcast %c15_i32 : i32 to vector<1x256xi32>
    %19 = arith.andi %17, %18 : vector<1x256xi32>
    %20 = vector.extract_strided_slice %16 {offsets = [0, 7], sizes = [16, 256], strides = [1, 1]} : vector<16x304xbf16> to vector<16x256xbf16>
    %c1_i32 = arith.constant 1 : i32
    %21 = vector.broadcast %c1_i32 : i32 to vector<1x256xi32>
    %22 = arith.cmpi sge, %19, %21 : vector<1x256xi32>
    %cst_11 = arith.constant 0.000000e+00 : bf16
    %23 = vector.broadcast %cst_11 : bf16 to vector<16x256xbf16>
    %24 = vector.shape_cast %22 : vector<1x256xi1> to vector<1x256xi1>
    %25 = vector.broadcast %24 : vector<1x256xi1> to vector<16x256xi1>
    %26 = arith.select %25, %20, %23 : vector<16x256xi1>, vector<16x256xbf16>
    %27 = vector.extract_strided_slice %16 {offsets = [0, 8], sizes = [16, 256], strides = [1, 1]} : vector<16x304xbf16> to vector<16x256xbf16>
    %28 = vector.extract_strided_slice %16 {offsets = [0, 9], sizes = [16, 256], strides = [1, 1]} : vector<16x304xbf16> to vector<16x256xbf16>
    %c14_i32 = arith.constant 14 : i32
    %29 = vector.broadcast %c14_i32 : i32 to vector<1x256xi32>
    %30 = arith.cmpi sle, %19, %29 : vector<1x256xi32>
    %cst_12 = arith.constant 0.000000e+00 : bf16
    %31 = vector.broadcast %cst_12 : bf16 to vector<16x256xbf16>
    %32 = vector.shape_cast %30 : vector<1x256xi1> to vector<1x256xi1>
    %33 = vector.broadcast %32 : vector<1x256xi1> to vector<16x256xi1>
    %34 = arith.select %33, %28, %31 : vector<16x256xi1>, vector<16x256xbf16>
    %35 = vector.extract_strided_slice %16 {offsets = [0, 23], sizes = [16, 256], strides = [1, 1]} : vector<16x304xbf16> to vector<16x256xbf16>
    %c1_i32_13 = arith.constant 1 : i32
    %36 = vector.broadcast %c1_i32_13 : i32 to vector<1x256xi32>
    %37 = arith.cmpi sge, %19, %36 : vector<1x256xi32>
    %cst_14 = arith.constant 0.000000e+00 : bf16
    %38 = vector.broadcast %cst_14 : bf16 to vector<16x256xbf16>
    %39 = vector.shape_cast %37 : vector<1x256xi1> to vector<1x256xi1>
    %40 = vector.broadcast %39 : vector<1x256xi1> to vector<16x256xi1>
    %41 = arith.select %40, %35, %38 : vector<16x256xi1>, vector<16x256xbf16>
    %42 = vector.extract_strided_slice %16 {offsets = [0, 24], sizes = [16, 256], strides = [1, 1]} : vector<16x304xbf16> to vector<16x256xbf16>
    %43 = vector.extract_strided_slice %16 {offsets = [0, 25], sizes = [16, 256], strides = [1, 1]} : vector<16x304xbf16> to vector<16x256xbf16>
    %c14_i32_15 = arith.constant 14 : i32
    %44 = vector.broadcast %c14_i32_15 : i32 to vector<1x256xi32>
    %45 = arith.cmpi sle, %19, %44 : vector<1x256xi32>
    %cst_16 = arith.constant 0.000000e+00 : bf16
    %46 = vector.broadcast %cst_16 : bf16 to vector<16x256xbf16>
    %47 = vector.shape_cast %45 : vector<1x256xi1> to vector<1x256xi1>
    %48 = vector.broadcast %47 : vector<1x256xi1> to vector<16x256xi1>
    %49 = arith.select %48, %43, %46 : vector<16x256xi1>, vector<16x256xbf16>
    %50 = vector.extract_strided_slice %16 {offsets = [0, 39], sizes = [16, 256], strides = [1, 1]} : vector<16x304xbf16> to vector<16x256xbf16>
    %c1_i32_17 = arith.constant 1 : i32
    %51 = vector.broadcast %c1_i32_17 : i32 to vector<1x256xi32>
    %52 = arith.cmpi sge, %19, %51 : vector<1x256xi32>
    %cst_18 = arith.constant 0.000000e+00 : bf16
    %53 = vector.broadcast %cst_18 : bf16 to vector<16x256xbf16>
    %54 = vector.shape_cast %52 : vector<1x256xi1> to vector<1x256xi1>
    %55 = vector.broadcast %54 : vector<1x256xi1> to vector<16x256xi1>
    %56 = arith.select %55, %50, %53 : vector<16x256xi1>, vector<16x256xbf16>
    %57 = vector.extract_strided_slice %16 {offsets = [0, 40], sizes = [16, 256], strides = [1, 1]} : vector<16x304xbf16> to vector<16x256xbf16>
    %58 = vector.extract_strided_slice %16 {offsets = [0, 41], sizes = [16, 256], strides = [1, 1]} : vector<16x304xbf16> to vector<16x256xbf16>
    %c14_i32_19 = arith.constant 14 : i32
    %59 = vector.broadcast %c14_i32_19 : i32 to vector<1x256xi32>
    %60 = arith.cmpi sle, %19, %59 : vector<1x256xi32>
    %cst_20 = arith.constant 0.000000e+00 : bf16
    %61 = vector.broadcast %cst_20 : bf16 to vector<16x256xbf16>
    %62 = vector.shape_cast %60 : vector<1x256xi1> to vector<1x256xi1>
    %63 = vector.broadcast %62 : vector<1x256xi1> to vector<16x256xi1>
    %64 = arith.select %63, %58, %61 : vector<16x256xi1>, vector<16x256xbf16>
    %65 = tpu.concatenate %26, %27, %34, %41, %42, %49, %56, %57, %64 in 0 : vector<16x256xbf16>, vector<16x256xbf16>, vector<16x256xbf16>, vector<16x256xbf16>, vector<16x256xbf16>, vector<16x256xbf16>, vector<16x256xbf16>, vector<16x256xbf16>, vector<16x256xbf16> -> vector<144x256xbf16>
    %c0_21 = arith.constant 0 : index
    %c0_22 = arith.constant 0 : index
    %66 = vector.load %arg5[%c0_21, %c0_22] : memref<16x144xbf16, #tpu.memory_space<vmem>>, vector<16x144xbf16>
    %cst_23 = arith.constant dense<0.000000e+00> : vector<16x256xf32>
    %67 = tpu.matmul %66, %65, %cst_23 {dimension_numbers = #tpu.dot_dimension_numbers<[1], [0], [0], [1], [0, 0, 1, 1], [], []>} : vector<16x144xbf16>, vector<144x256xbf16>, vector<16x256xf32> -> vector<16x256xf32>
    %c0_24 = arith.constant 0 : index
    %c0_25 = arith.constant 0 : index
    %68 = vector.load %arg6[%c0_24, %c0_25] : memref<16x1xf32, #tpu.memory_space<vmem>>, vector<16x1xf32>
    %69 = vector.broadcast %68 : vector<16x1xf32> to vector<16x256xf32>
    %70 = arith.mulf %67, %69 : vector<16x256xf32>
    %c0_26 = arith.constant 0 : index
    %c0_27 = arith.constant 0 : index
    %71 = vector.load %arg7[%c0_26, %c0_27] : memref<16x1xf32, #tpu.memory_space<vmem>>, vector<16x1xf32>
    %72 = vector.broadcast %71 : vector<16x1xf32> to vector<16x256xf32>
    %73 = arith.addf %70, %72 : vector<16x256xf32>
    %cst_28 = arith.constant 0.000000e+00 : f32
    %74 = vector.broadcast %cst_28 : f32 to vector<16x256xf32>
    %75 = arith.maximumf %73, %74 : vector<16x256xf32>
    %c0_29 = arith.constant 0 : index
    %c0_30 = arith.constant 0 : index
    %76 = vector.load %arg8[%c0_29, %c0_30] : memref<32x16xbf16, #tpu.memory_space<vmem>>, vector<32x16xbf16>
    %77 = arith.truncf %75 : vector<16x256xf32> to vector<16x256xbf16>
    %cst_31 = arith.constant dense<0.000000e+00> : vector<32x256xf32>
    %78 = tpu.matmul %76, %77, %cst_31 {dimension_numbers = #tpu.dot_dimension_numbers<[1], [0], [0], [1], [0, 0, 1, 1], [], []>} : vector<32x16xbf16>, vector<16x256xbf16>, vector<32x256xf32> -> vector<32x256xf32>
    %c0_32 = arith.constant 0 : index
    %c0_33 = arith.constant 0 : index
    %79 = vector.load %arg9[%c0_32, %c0_33] : memref<32x1xf32, #tpu.memory_space<vmem>>, vector<32x1xf32>
    %80 = vector.broadcast %79 : vector<32x1xf32> to vector<32x256xf32>
    %81 = arith.mulf %78, %80 : vector<32x256xf32>
    %c0_34 = arith.constant 0 : index
    %c0_35 = arith.constant 0 : index
    %82 = vector.load %arg10[%c0_34, %c0_35] : memref<32x1xf32, #tpu.memory_space<vmem>>, vector<32x1xf32>
    %83 = vector.broadcast %82 : vector<32x1xf32> to vector<32x256xf32>
    %84 = arith.addf %81, %83 : vector<32x256xf32>
    %85 = arith.addf %84, %1 : vector<32x256xf32>
    %cst_36 = arith.constant 0.000000e+00 : f32
    %86 = vector.broadcast %cst_36 : f32 to vector<32x256xf32>
    %87 = arith.maximumf %85, %86 : vector<32x256xf32>
    %c0_37 = arith.constant 0 : index
    %c0_38 = arith.constant 0 : index
    %c0_39 = arith.constant 0 : index
    %88 = vector.load %arg11[%c0_37, %c0_38, %c0_39] : memref<1x32x256xf32, #tpu.memory_space<vmem>>, vector<1x32x256xf32>
    %89 = vector.shape_cast %88 : vector<1x32x256xf32> to vector<32x256xf32>
    %90 = vector.shape_cast %87 : vector<32x256xf32> to vector<1x32x256xf32>
    tpu.vector_store %arg11[%c0_37, %c0_38, %c0_39], %90 {strides = array<i32>} : memref<1x32x256xf32, #tpu.memory_space<vmem>>, vector<1x32x256xf32>,
    return
  }
  func.func @transform_0(%arg0: i32) -> (i32, i32, i32) {
    %c0_i32 = arith.constant 0 : i32
    %c0_i32_0 = arith.constant 0 : i32
    %c0_i32_1 = arith.constant 0 : i32
    return %arg0, %c0_i32, %c0_i32_0 : i32, i32, i32
  }
  func.func @transform_1(%arg0: i32) -> (i32, i32) {
    %c0_i32 = arith.constant 0 : i32
    %c0_i32_0 = arith.constant 0 : i32
    %c0_i32_1 = arith.constant 0 : i32
    return %c0_i32, %c0_i32_0 : i32, i32
  }
  func.func @transform_2(%arg0: i32) -> (i32, i32) {
    %c0_i32 = arith.constant 0 : i32
    %c0_i32_0 = arith.constant 0 : i32
    %c0_i32_1 = arith.constant 0 : i32
    return %c0_i32, %c0_i32_0 : i32, i32
  }
  func.func @transform_3(%arg0: i32) -> (i32, i32) {
    %c0_i32 = arith.constant 0 : i32
    %c0_i32_0 = arith.constant 0 : i32
    %c0_i32_1 = arith.constant 0 : i32
    return %c0_i32, %c0_i32_0 : i32, i32
  }
  func.func @transform_4(%arg0: i32) -> (i32, i32) {
    %c0_i32 = arith.constant 0 : i32
    %c0_i32_0 = arith.constant 0 : i32
    %c0_i32_1 = arith.constant 0 : i32
    return %c0_i32, %c0_i32_0 : i32, i32
  }
  func.func @transform_5(%arg0: i32) -> (i32, i32) {
    %c0_i32 = arith.constant 0 : i32
    %c0_i32_0 = arith.constant 0 : i32
    %c0_i32_1 = arith.constant 0 : i32
    return %c0_i32, %c0_i32_0 : i32, i32
  }
  func.func @transform_6(%arg0: i32) -> (i32, i32) {
    %c0_i32 = arith.constant 0 : i32
    %c0_i32_0 = arith.constant 0 : i32
    %c0_i32_1 = arith.constant 0 : i32
    return %c0_i32, %c0_i32_0 : i32, i32
  }
  func.func @transform_7(%arg0: i32) -> (i32, i32) {
    %c0_i32 = arith.constant 0 : i32
    %c0_i32_0 = arith.constant 0 : i32
    %c0_i32_1 = arith.constant 0 : i32
    return %c0_i32, %c0_i32_0 : i32, i32
  }
  func.func @transform_8(%arg0: i32) -> (i32, i32) {
    %c0_i32 = arith.constant 0 : i32
    %c0_i32_0 = arith.constant 0 : i32
    %c0_i32_1 = arith.constant 0 : i32
    return %c0_i32, %c0_i32_0 : i32, i32
  }
  func.func @transform_9(%arg0: i32) -> (i32, i32) {
    %c0_i32 = arith.constant 0 : i32
    %c0_i32_0 = arith.constant 0 : i32
    %c0_i32_1 = arith.constant 0 : i32
    return %c0_i32, %c0_i32_0 : i32, i32
  }
  func.func @transform_10(%arg0: i32) -> (i32, i32, i32) {
    %c0_i32 = arith.constant 0 : i32
    %c0_i32_0 = arith.constant 0 : i32
    %c0_i32_1 = arith.constant 0 : i32
    return %arg0, %c0_i32, %c0_i32_0 : i32, i32, i32
  }
}

</mosaic_0001>

<bundles_post_ra>
// kernel: tpu_custom_call.1
= control target key start
LH: loop header
LB: loop body
LE: loop exit
PB: predicated region body
PF: predicated region fallthrough
CT: control target
= control target key end

     0   :  { %15 = vsyncpa [#allocation3], 0  ;;  %s1681_s0 = inlined_call_operand.vmem [shape: f32[2,32,256], index: 0, kind: input, shape index: {}]   ;;  %s1682_s1 = inlined_call_operand.vmem [shape: bf16[16,32], index: 1, kind: input, shape index: {}]   ;;  %s1683_s2 = inlined_call_operand.vmem [shape: f32[16,1], index: 2, kind: input, shape index: {}]   ;;  %s1684_s3 = inlined_call_operand.vmem [shape: f32[16,1], index: 3, kind: input, shape index: {}]   ;;  %s1685_s4 = inlined_call_operand.vmem [shape: bf16[16,144], index: 4, kind: input, shape index: {}]   ;;  %s1686_s5 = inlined_call_operand.vmem [shape: f32[16,1], index: 5, kind: input, shape index: {}]   ;;  %s1687_s6 = inlined_call_operand.vmem [shape: f32[16,1], index: 6, kind: input, shape index: {}]   ;;  %s1688_s7 = inlined_call_operand.vmem [shape: bf16[32,16], index: 7, kind: input, shape index: {}]   ;;  %s1689_s8 = inlined_call_operand.vmem [shape: f32[32,1], index: 8, kind: input, shape index: {}]   ;;  %s1690_s9 = inlined_call_operand.vmem [shape: f32[32,1], index: 9, kind: input, shape index: {}]   ;;  %s1691_s10 = inlined_call_operand.hbm [shape: f32[2,32,256], index: 10, kind: output, shape index: {}]  }
   0x1   :  { %17 = vsyncpa [#allocation3 + $0x1], 0  ;;  %s1337_s13 = smov 0   ;;  %s1339_s14 = smov 0  }
   0x2   :  { %s1341_s15 = smov 0   ;;  %s1343_s16 = smov 0  }
   0x3 LB: > { %s1358_s17 = sadd.s32 4294967295, %s1260_s16   ;;  %s1109_s18 = sadd.s32 4294967294, %s1260_s16   ;;  %s1260_s16 = sphi %s1343_s16, %s1705_s16   ;;  %s1256_s15 = sphi %s1341_s15, %s1704_s15   ;;  %s1252_s14 = sphi %s1339_s14, %s1703_s14   ;;  %s1248_s13 = sphi %s1337_s13, %s1702_s13  }
   0x4   : > { %s1362_s19 = sadd.s32 1, %s1260_s16   ;;  %s245_s20 = sadd.s32 1, %s1256_s15 }
   0x5   : > { %s242_s21 = ssub.s32 %s1260_s16, %s1362_s19  ;;  %p255_p0 = scmp.ne.s32.totalorder %s1256_s15, %s1252_s14 }
   0x6   : > { %p243_p1 = scmp.eq.s32.totalorder %s242_s21, 0  ;;  %p256_p2 = scmp.eq.s32.totalorder %s1358_s17, 1 }
   0x7   : > { %p261_p3 = scmp.ne.s32.totalorder %s1252_s14, %s1248_s13  ;;  %p262_p4 = scmp.eq.s32.totalorder %s1109_s18, 1 }
   0x8   : > { %s1373_s22 = scalar_select %p243_p1, %s1256_s15, %s245_s20  }
   0x9   : > { %p1375_p5 = por %p256_p2, %p255_p0  ;;  %p1379_p6 = por %p262_p4, %p261_p3 }
   0xa   : > { %p1112_p7 = scmp.ge.s32.totalorder %s1260_s16, 1  ;;  %p315_p8 = scmp.lt.s32.totalorder %s1260_s16, 3 }
   0xc   : > { %p316_p9 = pnand %p1112_p7, %p315_p8 }
   0xd   : > { %p353_p10 = scmp.lt.s32.totalorder (!%p316_p9), %s1358_s17, 1  ;;  %v1262_v0 = vmov (!%p316_p9), 0   ;;  %v427_v1 = vld [vmem:[%s1683_s2] sm:$0xff] (!%p316_p9)  ;;  %v428_v3 = vld [vmem:[%s1683_s2 + $0x8] sm:$0xff] (!%p316_p9)  ;;  %vm380_vm0 = vcmask (!%p316_p9), 261120   ;;  %v484_v18 = vlaneseq (!%p316_p9)  ;;  %s1264_s30 = smov (!%p316_p9), 9  }
   0xe   : > { %319 = sbr.rel (%p316_p9) target bundleno = 1140 (0x474), region = 60  ;;  %416 = vmatprep.mubr.bf16.mxu0 (!%p316_p9), %v1262_v0  ;;  %1190 = vset.pattern.permute.xlu0 (!%p316_p9), %v1262_v0  ;;  %v443_v2 = vld [vmem:[%s1684_s3] sm:$0xff] (!%p316_p9)  ;;  %v444_v4 = vld [vmem:[%s1684_s3 + $0x8] sm:$0xff] (!%p316_p9)  ;;  %s1265_s11 = smov (!%p316_p9), 23   ;;  %vm471_vm7 = vcmask (!%p316_p9), 195584   ;;  %vm549_vm9 = vcmask (!%p316_p9), 187392  }
   0xf   : > { %431 = vperm.xlu0 (!%p316_p9), %1190, %v427_v1   ;;  %1191 = vset.pattern.permute.xlu1 (!%p316_p9), %v1262_v0  ;;  %v1192_v17 = vld [vmem:[%s1682_s1] sm:$0xff] (!%p316_p9)   ;;  %v485_v19 = vand.u32 (!%p316_p9), 127, %v484_v18  ;;  %v498_v36 = vshrl.u32 (!%p316_p9), %v484_v18, 7  ;;  %s1267_s18 = smov (!%p316_p9), 39   ;;  %s1268_s20 = smov (!%p316_p9), 41   ;;  %vm537_vm10 = vcmask (!%p316_p9), 72704  }
  0x10   : > { %447 = vperm.xlu1 (!%p316_p9), %1191, %v443_v2   ;;  %s1269_s21 = smov (!%p316_p9), 7   ;;  %s1270_s25 = smov (!%p316_p9), 111   ;;  %vm481_vm12 = vcmask (!%p316_p9), 326656   ;;  %vm561_vm15 = vcmask (!%p316_p9), 203776  }
  0x11   : > { %v486_v20 = vadd.s32 (!%p316_p9), 128, %v485_v19  ;;  %v487_v23 = vand.u32 (!%p316_p9), 15, %v485_v19  ;;  %v503_v46 = vsub.s32 (!%p316_p9), 4, %v498_v36  ;;  %v499_v50 = vsub.s32 (!%p316_p9), 0, %v498_v36  ;;  %s1272_s27 = smov (!%p316_p9), 126   ;;  %s1273_s28 = smov (!%p316_p9), 112  }
  0x13   : > { %436 = vperm.xlu0 (!%p316_p9), %1190, %v428_v3   ;;  %v488_v24 = vand.u32 (!%p316_p9), 15, %v486_v20  ;;  %vm1433_vm1 = vcmp.le.s32.totalorder (!%p316_p9), %v487_v23, 14  ;;  %vm1445_vm4 = vcmp.ge.s32.totalorder (!%p316_p9), %v487_v23, 1 }
  0x14   : > { %452 = vperm.xlu1 (!%p316_p9), %1191, %v444_v4  }
  0x15   : > { %s354_s29 = scalar_select %p353_p10, %s1358_s17, 1  ;;  %vm1437_vm2 = vcmp.le.s32.totalorder %v488_v24, 14  ;;  %vm1449_vm5 = vcmp.ge.s32.totalorder %v488_v24, 1 }
  0x16   : > { %vm523_vm3 = vmpackc.low %vm1437_vm2, %vm1433_vm1 }
  0x17   : > { %s1130_s12 = sshll.u32 %s354_s29, 6  ;;  %v524_v49 = vsel %vm523_vm3, 65537, %v1262_v0  ;;  %vm495_vm6 = vmpackc.low %vm1449_vm5, %vm1445_vm4  ;;  %s1263_s29 = smov 24  }
  0x18   : > { %s357_s26 = scalar_lea.vmem %s1681_s0, %s1130_s12  ;;  %v532_v53 = vrot.slane %v524_v49, %v503_v46  ;;  %v528_v54 = vrot.slane %v524_v49, %v499_v50  ;;  %v496_v55 = vsel %vm495_vm6, 65537, %v1262_v0  ;;  %s1266_s12 = smov 25  }
  0x19   : > { %v1405_v5 = vld [vmem:[%s357_s26 + $0x8] sm:$0xff]  ;;  %v1407_v6 = vld [vmem:[%s357_s26 + $0x18] sm:$0xff]  ;;  %v1409_v7 = vld [vmem:[%s357_s26] sm:$0xff]  ;;  %v504_v56 = vrot.slane %v496_v55, %v503_v46  ;;  %v500_v57 = vrot.slane %v496_v55, %v499_v50 }
  0x1a   : > { %v370_v8 = vpack.c.bf16 %v1407_v6, %v1405_v5  ;;  %v1413_v9 = vld [vmem:[%s357_s26 + $0x10] sm:$0xff]  ;;  %v1415_v10 = vld [vmem:[%s357_s26 + $0x28] sm:$0xff]  ;;  %v1417_v11 = vld [vmem:[%s357_s26 + $0x38] sm:$0xff] }
  0x1b   : > { %v369_v12 = vpack.c.bf16 %v1413_v9, %v1409_v7  ;;  %v372_v13 = vpack.c.bf16 %v1417_v11, %v1415_v10  ;;  %v1423_v14 = vld [vmem:[%s357_s26 + $0x20] sm:$0xff]  ;;  %v1425_v15 = vld [vmem:[%s357_s26 + $0x30] sm:$0xff]  ;;  %s1271_s26 = smov 127  }
  0x1c   : > { %384 = vmatprep.subr.bf16.mxu0 %v370_v8  ;;  %v371_v16 = vpack.c.bf16 %v1425_v15, %v1423_v14 }
  0x1d   : > { %385 = vmatpush1.bf16.msra.mxu0 %v369_v12 }
  0x1e   : > { %386 = vmatprep.subr.bf16.mxu0 %v372_v13 }
  0x21   : > { %387 = vmatpush1.bf16.msra.mxu0 %v371_v16 }
  0x24   : > { %1117 = vmatmul.mubr.msk.bf16.vlgmr.msra.gmra.mrb[0].mxu0 %vm380_vm0, %v1192_v17  ;;  %vm573_vm0 = vcmask 318464  }
  0x25   : > { %924 = vmatprep.mubr.bf16.mxu0 %v1262_v0 }
  0x8e   : > { %v432_v21 = vpop.permute.xlu0 %431 }
  0x8f   : > { %v448_v22 = vpop.permute.xlu1 %447 }
  0x92   : > { %v437_v28 = vpop.permute.xlu0 %436 }
  0x93   : > { %v453_v37 = vpop.permute.xlu1 %452 }
  0xf7   : > { %v418_v25 = vpop.f32.mrb[0].mxu0 }
  0xf8   : > { %v439_v26 = vmul.f32 %v432_v21, %v418_v25  ;;  %v420_v27 = vpop.f32.mrb[1].mxu0 }
  0xf9   : > { %v440_v29 = vmul.f32 %v432_v21, %v420_v27  ;;  %v422_v30 = vpop.f32.mrb[2].mxu0 }
  0xfa   : > { %v455_v33 = vadd.f32 %v448_v22, %v439_v26  ;;  %v441_v34 = vmul.f32 %v437_v28, %v422_v30  ;;  %v424_v35 = vpop.f32.mrb[3].mxu0 }
  0xfb   : > { %v456_v38 = vadd.f32 %v448_v22, %v440_v29  ;;  %v442_v39 = vmul.f32 %v437_v28, %v424_v35 }
  0xfc   : > { %v457_v40 = vadd.f32 %v453_v37, %v441_v34  ;;  %v459_v44 = vmax.f32 %v455_v33, 0.0 }
  0xfd   : > { %v458_v41 = vadd.f32 %v453_v37, %v442_v39  ;;  %v460_v47 = vmax.f32 %v456_v38, 0.0 }
  0xfe   : > { %v461_v45 = vmax.f32 %v457_v40, 0.0 }
  0xff   : > { %v462_v48 = vmax.f32 %v458_v41, 0.0 }
 0x100   : > { %v463_v51 = vpack.c.bf16 %v461_v45, %v459_v44 }
 0x101   : > { %v464_v52 = vpack.c.bf16 %v462_v48, %v460_v47 }
 0x102   : > { %467 = vrot.lane.b32.xlu1 %v463_v51, %s1263_s29 }
 0x103   : > { %469 = vrot.lane.b32.xlu0 %v464_v52, %s1263_s29  ;;  %s1274_s29 = smov 110  }
 0x106   : > { %535 = vrot.lane.b32.xlu1 %v532_v53, %s1264_s30 }
 0x107   : > { %533 = vrot.lane.b32.xlu0 %v528_v54, %s1264_s30  ;;  %s1275_s30 = smov 96  }
 0x10a   : > { %547 = vrot.lane.b32.xlu1 %v504_v56, %s1265_s11 }
 0x10b   : > { %545 = vrot.lane.b32.xlu0 %v500_v57, %s1265_s11  ;;  %s1276_s11 = smov 95  }
 0x10e   : > { %559 = vrot.lane.b32.xlu1 %v532_v53, %s1266_s12 }
 0x10f   : > { %557 = vrot.lane.b32.xlu0 %v528_v54, %s1266_s12  ;;  %s1277_s12 = smov 94  }
 0x112   : > { %571 = vrot.lane.b32.xlu1 %v504_v56, %s1267_s18 }
 0x113   : > { %569 = vrot.lane.b32.xlu0 %v500_v57, %s1267_s18  ;;  %s1278_s18 = smov 121  }
 0x116   : > { %583 = vrot.lane.b32.xlu1 %v532_v53, %s1268_s20 }
 0x117   : > { %581 = vrot.lane.b32.xlu0 %v528_v54, %s1268_s20 }
 0x11a   : > { %507 = vrot.lane.b32.xlu1 %v504_v56, %s1269_s21 }
 0x11b   : > { %505 = vrot.lane.b32.xlu0 %v500_v57, %s1269_s21 }
 0x174   : > { %v468_v58 = vpop.permute.xlu1 %467 }
 0x175   : > { %v1460_v59 = vsel %vm471_vm7, 0, %v468_v58  ;;  %v470_v60 = vpop.permute.xlu0 %469 }
 0x176   : > { %628 = vrot.lane.b32.xlu1 %v1460_v59, %s1270_s25  ;;  %595 = vrot.lane.b32.xlu0 %v1460_v59, %s1271_s26  ;;  %v1466_v62 = vsel %vm471_vm7, %v468_v58, %v470_v60  ;;  %v480_v12 = vsel %vm471_vm7, %v470_v60, 0 }
 0x177   : > { %v1475_v18 = vsel %vm481_vm12, %v480_v12, 0 }
 0x178   : > { %v536_v61 = vpop.permute.xlu1 %535 }
 0x179   : > { %v534_v63 = vpop.permute.xlu0 %533  ;;  %vm541_vm1 = vcmp.ne.s16.totalorder %v536_v61, 0 }
 0x17a   : > { %vm539_vm8 = vcmp.ne.s16.totalorder %v534_v63, 0  ;;  %597 = vrot.lane.b32.xlu0 %v1466_v62, %s1271_s26  ;;  %v538_v16 = vsel %vm537_vm10, %v534_v63, %v536_v61  ;;  %v544_v26 = vsel %vm541_vm1, %v1475_v18, 0  ;;  %vm601_vm1 = vcmask 1039360  }
 0x17b   : > { %v542_v1 = vsel %vm539_vm8, %v1460_v59, 0  ;;  %vm540_vm14 = vcmp.ne.s16.totalorder %v538_v16, 0  ;;  %vm585_vm8 = vcmask 334848  }
 0x17c   : > { %v548_v2 = vpop.permute.xlu1 %547  ;;  %607 = vrot.lane.b32.xlu1 %v542_v1, %s1272_s27  ;;  %v543_v22 = vsel %vm540_vm14, %v1466_v62, 0 }
 0x17d   : > { %v546_v3 = vpop.permute.xlu0 %545  ;;  %vm553_vm2 = vcmp.ne.s16.totalorder %v548_v2, 0 }
 0x17e   : > { %v550_v4 = vsel %vm549_vm9, %v546_v3, %v548_v2  ;;  %vm551_vm11 = vcmp.ne.s16.totalorder %v546_v3, 0  ;;  %v556_v25 = vsel %vm553_vm2, %v1475_v18, 0  ;;  %vm613_vm2 = vcmask 1031168  }
 0x17f   : > { %v554_v8 = vsel %vm551_vm11, %v1460_v59, 0  ;;  %vm552_vm13 = vcmp.ne.s16.totalorder %v550_v4, 0  ;;  %vm509_vm11 = vcmask 56320  }
 0x180   : > { %v560_v13 = vpop.permute.xlu1 %559  ;;  %630 = vrot.lane.b32.xlu1 %v1466_v62, %s1270_s25  ;;  %619 = vrot.lane.b32.xlu0 %v554_v8, %s1273_s28  ;;  %v555_v19 = vsel %vm552_vm13, %v1466_v62, 0 }
 0x181   : > { %v558_v17 = vpop.permute.xlu0 %557  ;;  %vm565_vm5 = vcmp.ne.s16.totalorder %v560_v13, 0 }
 0x182   : > { %v562_v23 = vsel %vm561_vm15, %v558_v17, %v560_v13  ;;  %vm563_vm6 = vcmp.ne.s16.totalorder %v558_v17, 0  ;;  %v568_v30 = vsel %vm565_vm5, %v1475_v18, 0  ;;  %vm646_vm5 = vcmask 900096  }
 0x183   : > { %vm564_vm3 = vcmp.ne.s16.totalorder %v562_v23, 0  ;;  %v566_v29 = vsel %vm563_vm6, %v1460_v59, 0  ;;  %vm658_vm6 = vcmask 785408  }
 0x184   : > { %599 = vrot.lane.b32.xlu1 %v1475_v18, %s1271_s26  ;;  %621 = vrot.lane.b32.xlu0 %v555_v19, %s1273_s28  ;;  %v572_v20 = vpop.permute.xlu1 %571  ;;  %v567_v27 = vsel %vm564_vm3, %v1466_v62, 0  ;;  %vm634_vm3 = vcmask 908288  }
 0x185   : > { %v570_v21 = vpop.permute.xlu0 %569  ;;  %vm577_vm9 = vcmp.ne.s16.totalorder %v572_v20, 0 }
 0x186   : > { %v574_v24 = vsel %vm573_vm0, %v570_v21, %v572_v20  ;;  %vm575_vm7 = vcmp.ne.s16.totalorder %v570_v21, 0  ;;  %v580_v35 = vsel %vm577_vm9, %v1475_v18, 0  ;;  %vm787_vm9 = vcmask 130048  }
 0x187   : > { %vm576_vm4 = vcmp.ne.s16.totalorder %v574_v24, 0  ;;  %v578_v33 = vsel %vm575_vm7, %v1460_v59, 0  ;;  %vm667_vm7 = vcmask 777216  }
 0x188   : > { %609 = vrot.lane.b32.xlu1 %v543_v22, %s1272_s27  ;;  %632 = vrot.lane.b32.xlu0 %v1475_v18, %s1270_s25  ;;  %v579_v28 = vsel %vm576_vm4, %v1466_v62, 0  ;;  %v584_v31 = vpop.permute.xlu1 %583  ;;  %vm625_vm4 = vcmask 916480   ;;  %s1131_s25 = sshll.u32 %s1358_s17, 10 }
 0x189   : > { %v582_v32 = vpop.permute.xlu0 %581  ;;  %vm589_vm12 = vcmp.ne.s16.totalorder %v584_v31, 0 }
 0x18a   : > { %v586_v34 = vsel %vm585_vm8, %v582_v32, %v584_v31  ;;  %vm587_vm13 = vcmp.ne.s16.totalorder %v582_v32, 0  ;;  %v592_v40 = vsel %vm589_vm12, %v1475_v18, 0  ;;  %vm750_vm8 = vcmask 990208  }
 0x18b   : > { %vm588_vm10 = vcmp.ne.s16.totalorder %v586_v34, 0  ;;  %v590_v41 = vsel %vm587_vm13, %v1460_v59, 0 }
 0x18c   : > { %623 = vrot.lane.b32.xlu1 %v556_v25, %s1273_s28  ;;  %611 = vrot.lane.b32.xlu0 %v544_v26, %s1272_s27  ;;  %v508_v36 = vpop.permute.xlu1 %507  ;;  %v591_v38 = vsel %vm588_vm10, %v1466_v62, 0  ;;  %v1195_v26 = vld [vmem:[%s1685_s4 + $0x4] ss:$8 sps:$4 sm:$0xff]   ;;  %vm679_vm10 = vcmask 769024  }
 0x18d   : > { %v506_v37 = vpop.permute.xlu0 %505  ;;  %vm513_vm14 = vcmp.ne.s16.totalorder %v508_v36, 0  ;;  %1120 = vmatprep.mubr.msk.bf16.mxu1 %vm787_vm9, %v1195_v26 }
 0x18e   : > { %v510_v39 = vsel %vm509_vm11, %v506_v37, %v508_v36  ;;  %v516_v42 = vsel %vm513_vm14, %v1475_v18, 0  ;;  %vm511_vm0 = vcmp.ne.s16.totalorder %v506_v37, 0  ;;  %v834_v36 = vld [vmem:[%s1686_s5] sm:$0xff]  ;;  %v835_v37 = vld [vmem:[%s1686_s5 + $0x8] sm:$0xff] }
 0x18f   : > { %vm512_vm15 = vcmp.ne.s16.totalorder %v510_v39, 0  ;;  %v514_v44 = vsel %vm511_vm0, %v1460_v59, 0  ;;  %v851_v39 = vld [vmem:[%s1687_s6 + $0x8] sm:$0xff] }
 0x190   : > { %642 = vrot.lane.b32.xlu0 %v567_v27, %s1274_s29  ;;  %654 = vrot.lane.b32.xlu1 %v579_v28, %s1275_s30  ;;  %v515_v43 = vsel %vm512_vm15, %v1466_v62, 0 }
 0x194   : > { %640 = vrot.lane.b32.xlu0 %v566_v29, %s1274_s29  ;;  %644 = vrot.lane.b32.xlu1 %v568_v30, %s1274_s29  ;;  %s1631_s29 = scalar_lea.hbm %s1691_s10, %s1131_s25 }
 0x198   : > { %663 = vrot.lane.b32.xlu0 %v1466_v62, %s1276_s11  ;;  %652 = vrot.lane.b32.xlu1 %v578_v33, %s1275_s30 }
 0x19c   : > { %656 = vrot.lane.b32.xlu0 %v580_v35, %s1275_s30  ;;  %665 = vrot.lane.b32.xlu1 %v1475_v18, %s1276_s11 }
 0x1a0   : > { %661 = vrot.lane.b32.xlu0 %v1460_v59, %s1276_s11  ;;  %675 = vrot.lane.b32.xlu1 %v591_v38, %s1277_s12  ;;  %v850_v38 = vld [vmem:[%s1687_s6] sm:$0xff]  ;;  %s1279_s11 = smov [#allocation2]  }
 0x1a4   : > { %677 = vrot.lane.b32.xlu0 %v592_v40, %s1277_s12  ;;  %673 = vrot.lane.b32.xlu1 %v590_v41, %s1277_s12  ;;  %v945_v40 = vld [vmem:[%s1689_s8] sm:$0xff]  ;;  %v946_v41 = vld [vmem:[%s1689_s8 + $0x8] sm:$0xff]  ;;  %s1202_s12 = sshll.u32 %s1279_s11, 4  ;;  %s1203_s12 = int_to_ptr.vmem [resolvable:$false] %s1202_s12 }
 0x1a8   : > { %700 = vrot.lane.b32.xlu1 %v516_v42, %s1278_s18  ;;  %698 = vrot.lane.b32.xlu0 %v515_v43, %s1278_s18  ;;  %v947_v42 = vld [vmem:[%s1689_s8 + $0x10] sm:$0xff]  ;;  %v948_v43 = vld [vmem:[%s1689_s8 + $0x18] sm:$0xff] }
 0x1ac   : > { %696 = vrot.lane.b32.xlu0 %v514_v44, %s1278_s18  ;;  %v977_v44 = vld [vmem:[%s1690_s9] sm:$0xff] }
 0x1e8   : > { %v596_v45 = vpop.permute.xlu0 %595  ;;  %v629_v46 = vpop.permute.xlu1 %628 }
 0x1ec   : > { %v598_v47 = vpop.permute.xlu0 %597 }
 0x1ed   : > { %v602_v48 = vsel %vm601_vm1, %v596_v45, %v598_v47  ;;  %v978_v45 = vld [vmem:[%s1690_s9 + $0x8] sm:$0xff] }
 0x1ee   : > { %v608_v49 = vpop.permute.xlu1 %607  ;;  %702 = vrot.lane.b32.xlu1 %v602_v48, %s1278_s18 }
 0x1f2   : > { %v631_v50 = vpop.permute.xlu1 %630  ;;  %v620_v51 = vpop.permute.xlu0 %619 }
 0x1f3   : > { %v635_v13 = vsel %vm634_vm3, %v629_v46, %v631_v50  ;;  %v979_v46 = vld [vmem:[%s1690_s9 + $0x10] sm:$0xff] }
 0x1f6   : > { %v600_v52 = vpop.permute.xlu1 %599  ;;  %v622_v53 = vpop.permute.xlu0 %621 }
 0x1f7   : > { %706 = vrot.lane.b32.xlu0 %v600_v52, %s1278_s18  ;;  %v603_v59 = vsel %vm601_vm1, %v598_v47, %v600_v52  ;;  %v626_v2 = vsel %vm625_vm4, %v620_v51, %v622_v53  ;;  %v980_v47 = vld [vmem:[%s1690_s9 + $0x18] sm:$0xff] }
 0x1fa   : > { %v610_v54 = vpop.permute.xlu1 %609  ;;  %v633_v55 = vpop.permute.xlu0 %632 }
 0x1fb   : > { %724 = vrot.lane.b32.xlu1 %v633_v55, %s1278_s18  ;;  %v614_v56 = vsel %vm613_vm2, %v608_v49, %v610_v54  ;;  %v636_v62 = vsel %vm634_vm3, %v631_v50, %v633_v55 }
 0x1fc   : > { %708 = vrot.lane.b32.xlu0 %v614_v56, %s1278_s18 }
 0x1fe   : > { %v624_v57 = vpop.permute.xlu1 %623  ;;  %v612_v58 = vpop.permute.xlu0 %611 }
 0x1ff   : > { %704 = vrot.lane.b32.xlu1 %v603_v59, %s1278_s18  ;;  %v615_v3 = vsel %vm613_vm2, %v610_v54, %v612_v58  ;;  %v627_v18 = vsel %vm625_vm4, %v622_v53, %v624_v57 }
 0x200   : > { %718 = vrot.lane.b32.xlu0 %v624_v57, %s1278_s18 }
 0x202   : > { %v655_v60 = vpop.permute.xlu1 %654  ;;  %v643_v61 = vpop.permute.xlu0 %642 }
 0x203   : > { %712 = vrot.lane.b32.xlu1 %v612_v58, %s1278_s18 }
 0x204   : > { %722 = vrot.lane.b32.xlu0 %v636_v62, %s1278_s18 }
 0x206   : > { %v645_v63 = vpop.permute.xlu1 %644  ;;  %v641_v1 = vpop.permute.xlu0 %640 }
 0x207   : > { %714 = vrot.lane.b32.xlu1 %v626_v2, %s1278_s18  ;;  %v647_v12 = vsel %vm646_vm5, %v641_v1, %v643_v61  ;;  %v648_v24 = vsel %vm646_vm5, %v643_v61, %v645_v63 }
 0x208   : > { %710 = vrot.lane.b32.xlu0 %v615_v3, %s1278_s18 }
 0x20a   : > { %v653_v4 = vpop.permute.xlu1 %652  ;;  %v664_v8 = vpop.permute.xlu0 %663 }
 0x20b   : > { %726 = vrot.lane.b32.xlu1 %v647_v12, %s1278_s18  ;;  %v659_v21 = vsel %vm658_vm6, %v653_v4, %v655_v60 }
 0x20c   : > { %720 = vrot.lane.b32.xlu0 %v635_v13, %s1278_s18 }
 0x20e   : > { %v666_v16 = vpop.permute.xlu1 %665  ;;  %v657_v17 = vpop.permute.xlu0 %656 }
 0x20f   : > { %716 = vrot.lane.b32.xlu1 %v627_v18, %s1278_s18  ;;  %v660_v25 = vsel %vm658_vm6, %v655_v60, %v657_v17  ;;  %v669_v29 = vsel %vm667_vm7, %v664_v8, %v666_v16 }
 0x210   : > { %730 = vrot.lane.b32.xlu0 %v645_v63, %s1278_s18 }
 0x212   : > { %v676_v19 = vpop.permute.xlu1 %675  ;;  %v662_v20 = vpop.permute.xlu0 %661 }
 0x213   : > { %736 = vrot.lane.b32.xlu1 %v657_v17, %s1278_s18  ;;  %v668_v32 = vsel %vm667_vm7, %v662_v20, %v664_v8 }
 0x214   : > { %732 = vrot.lane.b32.xlu0 %v659_v21, %s1278_s18 }
 0x216   : > { %v674_v22 = vpop.permute.xlu1 %673  ;;  %v678_v23 = vpop.permute.xlu0 %677 }
 0x217   : > { %728 = vrot.lane.b32.xlu1 %v648_v24, %s1278_s18  ;;  %v681_v33 = vsel %vm679_vm10, %v676_v19, %v678_v23  ;;  %v680_v35 = vsel %vm679_vm10, %v674_v22, %v676_v19 }
 0x218   : > { %734 = vrot.lane.b32.xlu0 %v660_v25, %s1278_s18 }
 0x21a   : > { %v701_v27 = vpop.permute.xlu1 %700  ;;  %v699_v28 = vpop.permute.xlu0 %698 }
 0x21b   : > { %740 = vrot.lane.b32.xlu1 %v669_v29, %s1278_s18  ;;  %v752_v30 = vsel %vm750_vm8, %v699_v28, %v701_v27 }
 0x21c   : > { %742 = vrot.lane.b32.xlu0 %v666_v16, %s1278_s18  ;;  %791 = vmatprep.subr.bf16.mxu1 %v752_v30 }
 0x21e   : > { %v697_v31 = vpop.permute.xlu0 %696 }
 0x21f   : > { %738 = vrot.lane.b32.xlu1 %v668_v32, %s1278_s18  ;;  %v751_v34 = vsel %vm750_vm8, %v697_v31, %v699_v28 }
 0x220   : > { %746 = vrot.lane.b32.xlu0 %v681_v33, %s1278_s18  ;;  %792 = vmatpush1.bf16.msra.mxu1 %v751_v34  ;;  %v1193_v33 = vld [vmem:[%s1685_s4] ss:$8 sps:$4 sm:$0xff]  }
 0x223   : > { %748 = vrot.lane.b32.xlu1 %v678_v23, %s1278_s18 }
 0x224   : > { %744 = vrot.lane.b32.xlu0 %v680_v35, %s1278_s18  ;;  %s350_s18 = sand.u32 1, %s1252_s14  }
 0x225   : > { %s1113_s20 = sshll.u32 %s350_s18, 6  ;;  %s1640_s17 = scalar_lea.sflag [#allocation3], %s350_s18 }
 0x226   : > { %s1615_s21 = scalar_lea.vmem [#allocation2], %s1113_s20  ;;  %s1204_s20 = scalar_lea.vmem %s1203_s12, 2048 }
 0x227   : > { %838 = vperm.xlu1 %1191, %v834_v36   ;;  %s1047_s26 = sshll.u32 %s1615_s21, 4  ;;  %s1633_s26 = int_to_ptr.vmem [resolvable:$true] %s1047_s26 }
 0x228   : > { %843 = vperm.xlu0 %1190, %v835_v37   ;;  %s1198_s30 = scalar_lea.vmem %s1633_s26, 1024  ;;  %p1205_p0 = scmp.lt.s32.totalorder %s1633_s26, %s1203_s12 }
 0x229   : > { %p1199_p11 = scmp.ne.s32.totalorder %s1633_s26, %s1198_s30  ;;  %p1206_p1 = scmp.lt.s32.totalorder %s1204_s20, %s1198_s30 }
 0x22b   : > { %854 = vperm.xlu1 %1191, %v850_v38   ;;  %p1200_p12 = pnand %p1199_p11, %p1375_p5  ;;  %p1207_p2 = por %p1206_p1, %p1205_p0 }
 0x22c   : > { %859 = vperm.xlu0 %1190, %v851_v39  }
 0x22d   : > { %p1201_p13 = pneg %p1200_p12 }
 0x22f   : > { %951 = vperm.xlu1 %1191, %v945_v40   ;;  %p1208_p3 = pnand %p1207_p2, %p1201_p13 }
 0x230   : > { %956 = vperm.xlu0 %1190, %v946_v41  }
 0x233   : > { %961 = vperm.xlu1 %1191, %v947_v42  }
 0x234   : > { %966 = vperm.xlu0 %1190, %v948_v43  }
 0x237   : > { %983 = vperm.xlu1 %1191, %v977_v44  }
 0x238   : > { %988 = vperm.xlu0 %1190, %v978_v45  }
 0x23b   : > { %993 = vperm.xlu1 %1191, %v979_v46  }
 0x23c   : > { %998 = vperm.xlu0 %1190, %v980_v47  }
 0x260   : > { %v703_v48 = vpop.permute.xlu1 %702 }
 0x269   : > { %v707_v49 = vpop.permute.xlu0 %706 }
 0x26d   : > { %v725_v50 = vpop.permute.xlu1 %724 }
 0x26e   : > { %v709_v51 = vpop.permute.xlu0 %708 }
 0x271   : > { %v705_v52 = vpop.permute.xlu1 %704 }
 0x272   : > { %v719_v53 = vpop.permute.xlu0 %718  ;;  %v754_v54 = vsel %vm750_vm8, %v705_v52, %v707_v49  ;;  %v753_v55 = vsel %vm750_vm8, %v703_v48, %v705_v52 }
 0x273   : > { %793 = vmatprep.subr.bf16.mxu1 %v754_v54 }
 0x274   : > { %794 = vmatpush1.bf16.msra.mxu1 %v753_v55 }
 0x275   : > { %v713_v56 = vpop.permute.xlu1 %712 }
 0x276   : > { %v723_v57 = vpop.permute.xlu0 %722 }
 0x277   : > { %v760_v8 = vsel %vm750_vm8, %v723_v57, %v725_v50 }
 0x279   : > { %v715_v58 = vpop.permute.xlu1 %714 }
 0x27a   : > { %v711_v59 = vpop.permute.xlu0 %710 }
 0x27b   : > { %v756_v60 = vsel %vm750_vm8, %v711_v59, %v713_v56  ;;  %v755_v61 = vsel %vm750_vm8, %v709_v51, %v711_v59  ;;  %v1196_v56 = vld [vmem:[%s1688_s7] sm:$0xff]  }
 0x27c   : > { %795 = vmatprep.subr.bf16.mxu1 %v756_v60 }
 0x27d   : > { %v727_v62 = vpop.permute.xlu1 %726  ;;  %796 = vmatpush1.bf16.msra.mxu1 %v755_v61 }
 0x27e   : > { %v721_v63 = vpop.permute.xlu0 %720 }
 0x27f   : > { %v759_v16 = vsel %vm750_vm8, %v721_v63, %v723_v57  ;;  %v1197_v57 = vld [vmem:[%s1688_s7 + $0x8] sm:$0xff]  }
 0x281   : > { %v717_v1 = vpop.permute.xlu1 %716 }
 0x282   : > { %v731_v2 = vpop.permute.xlu0 %730  ;;  %v758_v3 = vsel %vm750_vm8, %v717_v1, %v719_v53  ;;  %v757_v4 = vsel %vm750_vm8, %v715_v58, %v717_v1 }
 0x283   : > { %797 = vmatprep.subr.bf16.mxu1 %v758_v3 }
 0x284   : > { %798 = vmatpush1.bf16.msra.mxu1 %v757_v4 }
 0x285   : > { %v737_v12 = vpop.permute.xlu1 %736  ;;  %799 = vmatprep.subr.bf16.mxu1 %v760_v8 }
 0x286   : > { %v733_v13 = vpop.permute.xlu0 %732 }
 0x288   : > { %800 = vmatpush1.bf16.msra.mxu1 %v759_v16 }
 0x289   : > { %v729_v17 = vpop.permute.xlu1 %728 }
 0x28a   : > { %v735_v18 = vpop.permute.xlu0 %734  ;;  %v762_v19 = vsel %vm750_vm8, %v729_v17, %v731_v2  ;;  %v761_v20 = vsel %vm750_vm8, %v727_v62, %v729_v17 }
 0x28b   : > { %801 = vmatprep.subr.bf16.mxu1 %v762_v19  ;;  %v764_v21 = vsel %vm750_vm8, %v735_v18, %v737_v12  ;;  %v763_v24 = vsel %vm750_vm8, %v733_v13, %v735_v18 }
 0x28c   : > { %802 = vmatpush1.bf16.msra.mxu1 %v761_v20 }
 0x28d   : > { %v741_v22 = vpop.permute.xlu1 %740  ;;  %803 = vmatprep.subr.bf16.mxu1 %v764_v21 }
 0x28e   : > { %v743_v23 = vpop.permute.xlu0 %742 }
 0x28f   : > { %v766_v25 = vsel %vm750_vm8, %v741_v22, %v743_v23 }
 0x290   : > { %804 = vmatpush1.bf16.msra.mxu1 %v763_v24 }
 0x291   : > { %v739_v26 = vpop.permute.xlu1 %738  ;;  %805 = vmatprep.subr.bf16.mxu1 %v766_v25 }
 0x292   : > { %v747_v27 = vpop.permute.xlu0 %746  ;;  %v765_v28 = vsel %vm750_vm8, %v739_v26, %v741_v22 }
 0x294   : > { %806 = vmatpush1.bf16.msra.mxu1 %v765_v28 }
 0x295   : > { %v749_v29 = vpop.permute.xlu1 %748 }
 0x296   : > { %v745_v30 = vpop.permute.xlu0 %744  ;;  %v768_v31 = vsel %vm750_vm8, %v747_v27, %v749_v29 }
 0x297   : > { %807 = vmatprep.subr.bf16.mxu1 %v768_v31  ;;  %v767_v32 = vsel %vm750_vm8, %v745_v30, %v747_v27 }
 0x298   : > { %808 = vmatpush1.bf16.msra.mxu1 %v767_v32 }
 0x29b   : > { %824 = vmatmul.mubr.bf16.vlgmr.msra.gmra.mrb[0].mxu1 %v1193_v33 }
 0x2a6   : > { %v839_v34 = vpop.permute.xlu1 %838 }
 0x2a7   : > { %v844_v35 = vpop.permute.xlu0 %843 }
 0x2aa   : > { %v855_v39 = vpop.permute.xlu1 %854 }
 0x2ab   : > { %v860_v45 = vpop.permute.xlu0 %859 }
 0x2ae   : > { %v952_v58 = vpop.permute.xlu1 %951 }
 0x2af   : > { %v957_v59 = vpop.permute.xlu0 %956 }
 0x2b2   : > { %v962_v60 = vpop.permute.xlu1 %961 }
 0x2b3   : > { %v967_v61 = vpop.permute.xlu0 %966 }
 0x2b6   : > { %v984_v2 = vpop.permute.xlu1 %983 }
 0x2b7   : > { %v989_v13 = vpop.permute.xlu0 %988 }
 0x2ba   : > { %v994_v29 = vpop.permute.xlu1 %993 }
 0x2bb   : > { %v999_v33 = vpop.permute.xlu0 %998 }
 0x36e   : > { %v825_v36 = vpop.f32.mrb[0].mxu1 }
 0x36f   : > { %v846_v37 = vmul.f32 %v839_v34, %v825_v36  ;;  %v827_v38 = vpop.f32.mrb[1].mxu1 }
 0x370   : > { %v847_v40 = vmul.f32 %v839_v34, %v827_v38  ;;  %v829_v41 = vpop.f32.mrb[2].mxu1 }
 0x371   : > { %v862_v42 = vadd.f32 %v855_v39, %v846_v37  ;;  %v848_v43 = vmul.f32 %v844_v35, %v829_v41  ;;  %v831_v44 = vpop.f32.mrb[3].mxu1 }
 0x372   : > { %v863_v46 = vadd.f32 %v855_v39, %v847_v40  ;;  %v849_v47 = vmul.f32 %v844_v35, %v831_v44 }
 0x373   : > { %v864_v48 = vadd.f32 %v860_v45, %v848_v43  ;;  %v866_v50 = vmax.f32 %v862_v42, 0.0 }
 0x374   : > { %v865_v49 = vadd.f32 %v860_v45, %v849_v47  ;;  %v867_v52 = vmax.f32 %v863_v46, 0.0 }
 0x375   : > { %v868_v51 = vmax.f32 %v864_v48, 0.0 }
 0x376   : > { %v869_v53 = vmax.f32 %v865_v49, 0.0 }
 0x377   : > { %v874_v54 = vpack.c.bf16 %v868_v51, %v866_v50 }
 0x378   : > { %v875_v55 = vpack.c.bf16 %v869_v53, %v867_v52 }
 0x37a   : > { %892 = vmatprep.subr.bf16.mxu0 %v875_v55 }
 0x37b   : > { %893 = vmatpush1.bf16.msra.mxu0 %v874_v54 }
 0x37e   : > { %1123 = vmatmul.mubr.msk.bf16.vlgmr.msra.gmra.mrb[4].mxu0 %vm787_vm9, %v1196_v56 }
 0x37f   : > { %934 = vmatprep.mubr.bf16.mxu0 %v1262_v0 }
 0x386   : > { %1124 = vmatmul.mubr.msk.bf16.gmra.mrb[8].mxu0 %vm787_vm9, %v1197_v57 }
 0x451   : > { %v926_v62 = vpop.f32.mrb[4].mxu0 }
 0x452   : > { %v969_v63 = vmul.f32 %v952_v58, %v926_v62  ;;  %v928_v1 = vpop.f32.mrb[5].mxu0 }
 0x453   : > { %v970_v3 = vmul.f32 %v952_v58, %v928_v1  ;;  %v930_v4 = vpop.f32.mrb[6].mxu0 }
 0x454   : > { %v1001_v0 = vadd.f32 %v984_v2, %v969_v63  ;;  %v971_v8 = vmul.f32 %v957_v59, %v930_v4  ;;  %v932_v12 = vpop.f32.mrb[7].mxu0 }
 0x455   : > { %v1002_v16 = vadd.f32 %v984_v2, %v970_v3  ;;  %v972_v17 = vmul.f32 %v957_v59, %v932_v12 }
 0x456   : > { %v1009_v18 = vadd.f32 %v1001_v0, %v1409_v7  ;;  %v1003_v19 = vadd.f32 %v989_v13, %v971_v8 }
 0x457   : > { %v1010_v20 = vadd.f32 %v1002_v16, %v1405_v5  ;;  %v1004_v21 = vadd.f32 %v989_v13, %v972_v17 }
 0x458   : > { %v1017_v22 = vmax.f32 %v1009_v18, 0.0  ;;  %v1011_v23 = vadd.f32 %v1003_v19, %v1413_v9 }
 0x459   : > { %v1018_v24 = vmax.f32 %v1010_v20, 0.0  ;;  %v1012_v25 = vadd.f32 %v1004_v21, %v1407_v6  ;;  %v936_v26 = vpop.f32.mrb[8].mxu0 }
 0x45a   : > { %1025 = vst [vmem:[%s1615_s21] sm:$0xff] %v1017_v22  ;;  %v1019_v27 = vmax.f32 %v1011_v23, 0.0  ;;  %v973_v7 = vmul.f32 %v962_v60, %v936_v26  ;;  %v938_v28 = vpop.f32.mrb[9].mxu0 }
 0x45b   : > { %1026 = vst [vmem:[%s1615_s21 + $0x8] sm:$0xff] %v1018_v24  ;;  %v1020_v5 = vmax.f32 %v1012_v25, 0.0  ;;  %v974_v9 = vmul.f32 %v962_v60, %v938_v28  ;;  %v940_v30 = vpop.f32.mrb[10].mxu0 }
 0x45c   : > { %1027 = vst [vmem:[%s1615_s21 + $0x10] sm:$0xff] %v1019_v27  ;;  %v1005_v6 = vadd.f32 %v994_v29, %v973_v7  ;;  %v975_v31 = vmul.f32 %v967_v61, %v940_v30  ;;  %v942_v32 = vpop.f32.mrb[11].mxu0 }
 0x45d   : > { %1028 = vst [vmem:[%s1615_s21 + $0x18] sm:$0xff] %v1020_v5  ;;  %v1006_v34 = vadd.f32 %v994_v29, %v974_v9  ;;  %v976_v35 = vmul.f32 %v967_v61, %v942_v32 }
 0x45e   : > { %v1013_v36 = vadd.f32 %v1005_v6, %v1423_v14  ;;  %v1007_v37 = vadd.f32 %v999_v33, %v975_v31 }
 0x45f   : > { %v1014_v38 = vadd.f32 %v1006_v34, %v1415_v10  ;;  %v1008_v39 = vadd.f32 %v999_v33, %v976_v35 }
 0x460   : > { %v1021_v40 = vmax.f32 %v1013_v36, 0.0  ;;  %v1015_v41 = vadd.f32 %v1007_v37, %v1425_v15 }
 0x461   : > { %v1022_v42 = vmax.f32 %v1014_v38, 0.0  ;;  %v1016_v43 = vadd.f32 %v1008_v39, %v1417_v11 }
 0x462   : > { %1029 = vst [vmem:[%s1615_s21 + $0x20] sm:$0xff] %v1021_v40  ;;  %v1023_v44 = vmax.f32 %v1015_v41, 0.0 }
 0x463   : > { %1030 = vst [vmem:[%s1615_s21 + $0x28] sm:$0xff] %v1022_v42  ;;  %v1024_v10 = vmax.f32 %v1016_v43, 0.0 }
 0x464   : > { %1031 = vst [vmem:[%s1615_s21 + $0x30] sm:$0xff] %v1023_v44 }
 0x465   : > { %1032 = vst [vmem:[%s1615_s21 + $0x38] sm:$0xff] %v1024_v10 }
 0x466   : > { %1211 = shalt.err (!%p1208_p3)
}
 0x467   : > { %s1212_s18 = scalar_lea.hbm %s1631_s29, 1024  ;;  %s1216_s27 = scalar_lea.hbm %s1691_s10, 2048 }
 0x468   : > { %p1213_p4 = scmp.ne.s32.totalorder %s1631_s29, %s1212_s18  ;;  %p1217_p9 = scmp.lt.u32.totalorder %s1631_s29, %s1691_s10 }
 0x469   : > { %p1218_p10 = scmp.lt.u32.totalorder %s1216_s27, %s1212_s18  ;;  %p1220_p12 = scmp.lt.u32.totalorder %s1212_s18, %s1631_s29 }
 0x46a   : > { %p1214_p7 = pnand %p1213_p4, %p1375_p5 }
 0x46b   : > { %p1219_p11 = por %p1218_p10, %p1217_p9 }
 0x46c   : > { %p1215_p8 = pneg %p1214_p7 }
 0x46d   : > { %p1221_p13 = por %p1220_p12, %p1219_p11 }
 0x46f   : > { %p1222_p0 = pnand %p1221_p13, %p1215_p8 }
 0x471   : > { %1225 = shalt.err (!%p1222_p0)
}
 0x472   : > { %s1280_s30 = smov 256   ;;  %s1281_s12 = smov 16  }
 0x473   : > { %1132 = dma.vmem_to_hbm [thread:$0]  (%p1375_p5), %s1633_s26, 1024, %s1631_s29, %s1640_s17, %s1280_s30, %s1280_s30, %s1281_s12  }
 0x474 PF: > { %p1138_p1 = scmp.ge.s32.totalorder %s1260_s16, 2  ;;  %s1062_s20 = sand.u32 1, %s1248_s13  }
 0x475   : > { %s1063_s18 = scalar_lea.sflag [#allocation3], %s1062_s20 }
 0x476   : > { %p1135_p2 = pnand %p1138_p1, %p1379_p6 }
 0x478   : > { %1243 = dma.done.wait (!%p1135_p2), %s1063_s18, 1024  }
 0x479   : > { %1245 = vsyncadd (!%p1135_p2), %s1063_s18, 4294966272  ;;  %p20_p3 = scmp.ge.s32.totalorder %s1362_s19, 4   ;;  %s1702_s13 = smov %s1252_s14 }
 0x47a   : > { %s1703_s14 = smov %s1256_s15  ;;  %s1704_s15 = smov %s1373_s22 }
 0x47b   : > { %s1705_s16 = smov %s1362_s19  ;;  %22 = sbr.rel (!%p20_p3) target bundleno = 3 (0x3), region = 95 }
 0x482   :  { %1068 = vsyncpa [#allocation3], 1 }
 0x483   :  { %1070 = vsyncpa [#allocation3 + $0x1], 1 }

</bundles_post_ra>
